<compile_context>
chip_gen: v7x
topology: tpu7x:2x2x1
jax: 0.10.0
libtpu: 0.0.40
codegen_flags: <defaults>
</compile_context>

<pallas_src>
import functools

import jax
import jax.numpy as jnp
from jax.experimental import pallas as pl
from jax.experimental.pallas import tpu as pltpu


def _dice_kernel(p_ref, t_ref, pt_ref, s_ref, *, d_valid, tile_d, need_mask):
    """Grid = (row_blocks, d_tiles); axis 1 is the reduction (feature) axis.

    p_ref / t_ref : (block_rows, tile_d) VMEM tiles of raw preds / targets
    pt_ref        : (block_rows, 128) f32 lane-wide accumulator of sigmoid(p)*t
    s_ref         : (block_rows, 128) f32 lane-wide accumulator of sigmoid(p)+t
    """
    k = pl.program_id(1)

    @pl.when(k == 0)
    def _():
        pt_ref[...] = jnp.zeros_like(pt_ref)
        s_ref[...] = jnp.zeros_like(s_ref)

    x = p_ref[...].astype(jnp.float32)
    t = t_ref[...].astype(jnp.float32)
    # sigmoid(x) = 0.5 * tanh(0.5 * x) + 0.5  -> a single EUP push per element.
    p = 0.5 * jnp.tanh(0.5 * x) + 0.5

    if need_mask:
        # Last tile may extend past the real feature dim: zero out OOB columns
        # (jnp.where is NaN-safe w.r.t. garbage in the OOB region of the tile).
        col = jax.lax.broadcasted_iota(jnp.int32, x.shape, 1) + k * tile_d
        valid = col < d_valid
        p = jnp.where(valid, p, 0.0)
        t = jnp.where(valid, t, 0.0)

    pt = pt_ref[...]
    s = s_ref[...]
    # Lane-wide accumulation: pure VPU adds per 128-lane chunk, no XLU reduce.
    for j in range(tile_d // 128):
        pc = p[:, j * 128:(j + 1) * 128]
        tc = t[:, j * 128:(j + 1) * 128]
        pt = pt + pc * tc
        s = s + pc + tc
    pt_ref[...] = pt
    s_ref[...] = s


def _pick_block_rows(rows):
    """Largest multiple-of-8 divisor of `rows` that is <= min(512, rows // 2).

    Keeps >= 2 row blocks whenever possible so the 'parallel' grid axis can be
    sharded across v7x's two TensorCores; falls back to one full-height block.
    """
    best = None
    cap = min(512, rows // 2)
    for br in range(8, cap + 1, 8):
        if rows % br == 0:
            best = br
    return best if best is not None else rows


def dice_loss_pallas(preds, targets, *, eps=0.001, loss_weight=1.0,
                     reduction="mean"):
    """DiceLoss.forward with use_sigmoid=True, weight=None, avg_factor=None."""
    n = preds.shape[0]
    p2 = preds.reshape(n, -1)                 # torch .flatten(1)
    t2 = targets.reshape(n, -1)               # keep native dtype; cast in-kernel
    d = p2.shape[1]

    # Sublane fill for tiny N: view each sample as `split` sub-rows (row-major
    # reshape is a free view, and a sample's sums = sums over its sub-rows).
    split = 1
    if n < 8:
        for s in (8, 4, 2):
            if d % s == 0:
                split = s
                break
    rows = n * split
    d_inner = d // split
    p2 = p2.reshape(rows, d_inner)
    t2 = t2.reshape(rows, d_inner)

    block_rows = _pick_block_rows(rows)
    n_row_blocks = rows // block_rows

    # VMEM-budgeted lane tile: biggest multiple of 128 (<= 4096) keeping the two
    # double-buffered input blocks under ~8 MiB (safe on v5e's 16 MiB default
    # scoped VMEM and v7x's 64 MiB physical VMEM).
    bytes_per_col = 2 * block_rows * (p2.dtype.itemsize + t2.dtype.itemsize)
    max_cols = (8 * 1024 * 1024) // bytes_per_col
    tile_d = min(4096, max(128, (max_cols // 128) * 128))
    tile_d = min(tile_d, pl.cdiv(d_inner, 128) * 128)
    n_d_tiles = pl.cdiv(d_inner, tile_d)
    need_mask = (n_d_tiles * tile_d != d_inner)

    kernel = functools.partial(_dice_kernel, d_valid=d_inner, tile_d=tile_d,
                               need_mask=need_mask)

    cost = pl.CostEstimate(
        flops=int(4 * rows * d_inner),
        transcendentals=int(rows * d_inner),
        bytes_accessed=int(rows * d_inner
                           * (p2.dtype.itemsize + t2.dtype.itemsize)
                           + 2 * rows * 128 * 4),
    )

    pt_out, s_out = pl.pallas_call(
        kernel,
        out_shape=(jax.ShapeDtypeStruct((rows, 128), jnp.float32),
                   jax.ShapeDtypeStruct((rows, 128), jnp.float32)),
        grid_spec=pltpu.PrefetchScalarGridSpec(
            num_scalar_prefetch=0,
            grid=(n_row_blocks, n_d_tiles),
            in_specs=[
                pl.BlockSpec((block_rows, tile_d), lambda i, k: (i, k)),
                pl.BlockSpec((block_rows, tile_d), lambda i, k: (i, k)),
            ],
            out_specs=[
                pl.BlockSpec((block_rows, 128), lambda i, k: (i, 0)),
                pl.BlockSpec((block_rows, 128), lambda i, k: (i, 0)),
            ],
        ),
        compiler_params=pltpu.CompilerParams(
            dimension_semantics=("parallel", "arbitrary"),
            vmem_limit_bytes=32 * 1024 * 1024,
        ),
        cost_estimate=cost,
    )(p2, t2)

    # Fold sub-rows + lanes back to per-sample sums (tiny XLA reduction).
    pt_sum = jnp.sum(pt_out.reshape(n, split * 128), axis=1)   # sum(p * t)
    s_sum = jnp.sum(s_out.reshape(n, split * 128), axis=1)     # sum(p) + sum(t)

    numerator = 2.0 * pt_sum + eps
    denominator = s_sum + eps
    loss = 1.0 - (numerator + 1.0) / (denominator + 1.0)

    # weight_reduce_loss glue (weight=None, avg_factor=None):
    # TODO(synk): per-sample `weight` / `avg_factor` paths not exercised here.
    if reduction == "mean":
        loss = jnp.mean(loss)
    elif reduction == "sum":
        loss = jnp.sum(loss)
    return loss_weight * loss


def dice_loss_reference(preds, targets, *, eps=0.001, loss_weight=1.0):
    n = preds.shape[0]
    p = jax.nn.sigmoid(preds.reshape(n, -1).astype(jnp.float32))
    t = targets.reshape(n, -1).astype(jnp.float32)
    num = 2.0 * jnp.sum(p * t, axis=1) + eps
    den = jnp.sum(p, axis=1) + jnp.sum(t, axis=1) + eps
    loss = 1.0 - (num + 1.0) / (den + 1.0)
    return loss_weight * jnp.mean(loss)


if __name__ == "__main__":
    key = jax.random.PRNGKey(0)
    k1, k2 = jax.random.split(key)
    N, C, H, W = 2, 4, 16, 16
    preds = jax.random.normal(k1, (N, C, H, W), dtype=jnp.float32)
    targets = (jax.random.uniform(k2, (N, C, H, W)) > 0.5).astype(jnp.float32)

    out = dice_loss_pallas(preds, targets)
    out = jax.block_until_ready(out)

    ref = dice_loss_reference(preds, targets)
    assert jnp.allclose(out, ref, atol=1e-5, rtol=1e-5), (out, ref)
    print("KERNEL_OK")
</pallas_src>

<mosaic_0001>
module attributes {stable_mosaic.version = 11 : i64} {
  func.func @_dice_kernel(%arg0: i32, %arg1: i32, %arg2: memref<8x128xf32, #tpu.memory_space<vmem>>, %arg3: memref<8x128xf32, #tpu.memory_space<vmem>>, %arg4: memref<8x128xf32, #tpu.memory_space<vmem>>, %arg5: memref<8x128xf32, #tpu.memory_space<vmem>>) attributes {dimension_semantics = [#tpu.dimension_semantics<parallel>, #tpu.dimension_semantics<arbitrary>], iteration_bounds = array<i64: 2, 1>, scalar_prefetch = 0 : i64, scratch_operands = 0 : i64, tpu.core_type = #tpu.core_type<tc>, window_params = [{transform_indices = @transform_0, window_bounds = array<i64: 8, 128>}, {transform_indices = @transform_1, window_bounds = array<i64: 8, 128>}, {transform_indices = @transform_2, window_bounds = array<i64: 8, 128>}, {transform_indices = @transform_3, window_bounds = array<i64: 8, 128>}]} {
    %c0_i32 = arith.constant 0 : i32
    %0 = arith.cmpi eq, %arg1, %c0_i32 : i32
    %1 = arith.extui %0 : i1 to i32
    %c0_i32_0 = arith.constant 0 : i32
    %2 = arith.cmpi ne, %1, %c0_i32_0 : i32
    scf.if %2 {
      %cst_14 = arith.constant 0.000000e+00 : f32
      %20 = vector.broadcast %cst_14 : f32 to vector<8x128xf32>
      %c0_15 = arith.constant 0 : index
      %c0_16 = arith.constant 0 : index
      %21 = vector.load %arg4[%c0_15, %c0_16] : memref<8x128xf32, #tpu.memory_space<vmem>>, vector<8x128xf32>
      tpu.vector_store %arg4[%c0_15, %c0_16], %20 {strides = array<i32>} : memref<8x128xf32, #tpu.memory_space<vmem>>, vector<8x128xf32>,
      %cst_17 = arith.constant 0.000000e+00 : f32
      %22 = vector.broadcast %cst_17 : f32 to vector<8x128xf32>
      %c0_18 = arith.constant 0 : index
      %c0_19 = arith.constant 0 : index
      %23 = vector.load %arg5[%c0_18, %c0_19] : memref<8x128xf32, #tpu.memory_space<vmem>>, vector<8x128xf32>
      tpu.vector_store %arg5[%c0_18, %c0_19], %22 {strides = array<i32>} : memref<8x128xf32, #tpu.memory_space<vmem>>, vector<8x128xf32>,
    } else {
    }
    %c0 = arith.constant 0 : index
    %c0_1 = arith.constant 0 : index
    %3 = vector.load %arg2[%c0, %c0_1] : memref<8x128xf32, #tpu.memory_space<vmem>>, vector<8x128xf32>
    %c0_2 = arith.constant 0 : index
    %c0_3 = arith.constant 0 : index
    %4 = vector.load %arg3[%c0_2, %c0_3] : memref<8x128xf32, #tpu.memory_space<vmem>>, vector<8x128xf32>
    %cst = arith.constant 5.000000e-01 : f32
    %5 = vector.broadcast %cst : f32 to vector<8x128xf32>
    %6 = arith.mulf %5, %3 : vector<8x128xf32>
    %7 = math.tanh %6 : vector<8x128xf32>
    %cst_4 = arith.constant 5.000000e-01 : f32
    %8 = vector.broadcast %cst_4 : f32 to vector<8x128xf32>
    %9 = arith.mulf %8, %7 : vector<8x128xf32>
    %cst_5 = arith.constant 5.000000e-01 : f32
    %10 = vector.broadcast %cst_5 : f32 to vector<8x128xf32>
    %11 = arith.addf %9, %10 : vector<8x128xf32>
    %c0_6 = arith.constant 0 : index
    %c0_7 = arith.constant 0 : index
    %12 = vector.load %arg4[%c0_6, %c0_7] : memref<8x128xf32, #tpu.memory_space<vmem>>, vector<8x128xf32>
    %c0_8 = arith.constant 0 : index
    %c0_9 = arith.constant 0 : index
    %13 = vector.load %arg5[%c0_8, %c0_9] : memref<8x128xf32, #tpu.memory_space<vmem>>, vector<8x128xf32>
    %14 = arith.mulf %11, %4 : vector<8x128xf32>
    %15 = arith.addf %12, %14 : vector<8x128xf32>
    %16 = arith.addf %13, %11 : vector<8x128xf32>
    %17 = arith.addf %16, %4 : vector<8x128xf32>
    %c0_10 = arith.constant 0 : index
    %c0_11 = arith.constant 0 : index
    %18 = vector.load %arg4[%c0_10, %c0_11] : memref<8x128xf32, #tpu.memory_space<vmem>>, vector<8x128xf32>
    tpu.vector_store %arg4[%c0_10, %c0_11], %15 {strides = array<i32>} : memref<8x128xf32, #tpu.memory_space<vmem>>, vector<8x128xf32>,
    %c0_12 = arith.constant 0 : index
    %c0_13 = arith.constant 0 : index
    %19 = vector.load %arg5[%c0_12, %c0_13] : memref<8x128xf32, #tpu.memory_space<vmem>>, vector<8x128xf32>
    tpu.vector_store %arg5[%c0_12, %c0_13], %17 {strides = array<i32>} : memref<8x128xf32, #tpu.memory_space<vmem>>, vector<8x128xf32>,
    return
  }
  func.func @transform_0(%arg0: i32, %arg1: i32) -> (i32, i32) {
    %c0_i32 = arith.constant 0 : i32
    return %arg0, %arg1 : i32, i32
  }
  func.func @transform_1(%arg0: i32, %arg1: i32) -> (i32, i32) {
    %c0_i32 = arith.constant 0 : i32
    return %arg0, %arg1 : i32, i32
  }
  func.func @transform_2(%arg0: i32, %arg1: i32) -> (i32, i32) {
    %c0_i32 = arith.constant 0 : i32
    %c0_i32_0 = arith.constant 0 : i32
    return %arg0, %c0_i32 : i32, i32
  }
  func.func @transform_3(%arg0: i32, %arg1: i32) -> (i32, i32) {
    %c0_i32 = arith.constant 0 : i32
    %c0_i32_0 = arith.constant 0 : i32
    return %arg0, %c0_i32 : i32, i32
  }
}

</mosaic_0001>

<bundles_post_ra>
// kernel: tpu_custom_call.1
= control target key start
LH: loop header
LB: loop body
LE: loop exit
PB: predicated region body
PF: predicated region fallthrough
CT: control target
= control target key end

     0   :  { %9 = vsyncpa [#allocation3], 0  ;;  %s986_s0 = inlined_call_operand.hbm [shape: f32[16,128], index: 0, kind: input, shape index: {}]   ;;  %s987_s1 = inlined_call_operand.hbm [shape: f32[16,128], index: 1, kind: input, shape index: {}]   ;;  %s988_s2 = inlined_call_operand.hbm [shape: f32[16,128], index: 2, kind: output, shape index: {0}]   ;;  %s989_s3 = inlined_call_operand.hbm [shape: f32[16,128], index: 3, kind: output, shape index: {1}]  }
   0x1   :  { %11 = vsyncpa [#allocation3 + $0x1], 0 }
   0x2   :  { %12 = vsyncpa [#allocation6], 0 }
   0x3   :  { %14 = vsyncpa [#allocation6 + $0x1], 0 }
   0x4   :  { %15 = vsyncpa [#allocation4], 0 }
   0x5   :  { %17 = vsyncpa [#allocation4 + $0x1], 0 }
   0x6   :  { %18 = vsyncpa [#allocation9], 0 }
   0x7   :  { %20 = vsyncpa [#allocation9 + $0x1], 0  ;;  %s737_s12 = smov 0   ;;  %s739_s13 = smov 0  }
   0x8   :  { %s741_s14 = smov 0   ;;  %s743_s15 = smov 0  }
   0x9   :  { %s745_s16 = smov 0   ;;  %s747_s17 = smov 0  }
   0xa LB: > { %s439_s18 = sadd.s32 4294967295, %s711_s17   ;;  %s440_s19 = sadd.s32 4294967294, %s711_s17   ;;  %s711_s17 = sphi %s747_s17, %s26_s17   ;;  %s707_s16 = sphi %s745_s16, %s1009_s16   ;;  %s703_s15 = sphi %s743_s15, %s1008_s15   ;;  %s699_s14 = sphi %s741_s14, %s1007_s14   ;;  %s695_s13 = sphi %s739_s13, %s1006_s13   ;;  %s691_s12 = sphi %s737_s12, %s1005_s12  }
   0xb   : > { %s38_s20 = sadd.s32 1, %s707_s16  ;;  %s47_s21 = sadd.s32 1, %s699_s14 }
   0xc   : > { %p40_p0 = scmp.ge.s32.totalorder %s38_s20, 2  ;;  %p54_p1 = scmp.ne.s32.totalorder %s699_s14, %s695_s13 }
   0xd   : > { %p55_p2 = scmp.eq.s32.totalorder %s711_s17, 0  ;;  %p60_p3 = scmp.ne.s32.totalorder %s695_s13, %s691_s12 }
   0xe   : > { %s1011_s20 = smov (%p40_p0, %s38_s20), 0  ;;  %p61_p5 = scmp.eq.s32.totalorder %s439_s18, 0 }
   0xf   : > { %p778_p4 = por %p55_p2, %p54_p1  ;;  %s42_s23 = ssub.s32 %s707_s16, %s1011_s20 }
  0x10   : > { %p112_p6 = scmp.eq.s32.totalorder %s439_s18, 1  ;;  %p45_p7 = scmp.eq.s32.totalorder %s42_s23, 0 }
  0x11   : > { %p784_p8 = por %p61_p5, %p60_p3  ;;  %p118_p10 = scmp.eq.s32.totalorder %s440_s19, 1 }
  0x12   : > { %p788_p9 = por %p112_p6, %p54_p1  ;;  %p480_p13 = scmp.lt.s32.totalorder %s711_s17, 2 }
  0x13   : > { %s993_s24 = scalar_select %p784_p8, 1, 0 }
  0x14   : > { %s994_s25 = scalar_select %p788_p9, 1, 0 }
  0x15   : > { %s793_s26 = scalar_select %p45_p7, %s699_s14, %s47_s21  }
  0x16   : > { %p795_p11 = por %p118_p10, %p60_p3  ;;  %s802_s28 = sand.u32 1, %s699_s14  }
  0x17   : > { %s443_s29 = sshll.u32 %s802_s28, 3  ;;  %s444_s30 = sshll.u32 %s707_s16, 7 }
  0x18   : > { %s995_s27 = scalar_select %p795_p11, 1, 0 }
  0x19   : > { %s811_s6 = scalar_lea.hbm %s986_s0, %s444_s30  ;;  %s168_s7 = scalar_lea.vmem [#allocation2], %s443_s29 }
  0x1a   : > { %s176_s8 = sshll.u32 %s168_s7, 4  ;;  %p819_p0 = pnand %p480_p13, %p778_p4  ;;  %s815_s8 = int_to_ptr.vmem [resolvable:$true] %s176_s8 }
  0x1b   : > { %s165_s10 = scalar_lea.sflag [#allocation3], %s802_s28  ;;  %s533_s11 = scalar_lea.hbm %s811_s6, 128 }
  0x1c   : > { %p534_p3 = scmp.ne.s32.totalorder %s811_s6, %s533_s11  ;;  %p535_p5 = pneg %p819_p0 }
  0x1d   : > { %s538_s21 = scalar_lea.hbm %s986_s0, 256  ;;  %p539_p4 = scmp.lt.u32.totalorder %s811_s6, %s986_s0 }
  0x1e   : > { %p536_p6 = pnand %p535_p5, %p534_p3  ;;  %p540_p10 = scmp.lt.u32.totalorder %s538_s21, %s533_s11 }
  0x1f   : > { %p542_p12 = scmp.lt.u32.totalorder %s533_s11, %s811_s6 }
  0x20   : > { %p537_p7 = pneg %p536_p6  ;;  %p541_p13 = por %p540_p10, %p539_p4 }
  0x22   : > { %p543_p1 = por %p542_p12, %p541_p13 }
  0x24   : > { %p544_p2 = pnand %p543_p1, %p537_p7 }
  0x26   : > { %547 = shalt.err (!%p544_p2)
}
  0x27   : > { %s548_s4 = scalar_lea.vmem %s815_s8, 128  ;;  %s713_s5 = smov [#allocation2]  }
  0x28   : > { %p549_p3 = scmp.ne.s32.totalorder %s815_s8, %s548_s4  ;;  %s553_s7 = sshll.u32 %s713_s5, 4  ;;  %s554_s7 = int_to_ptr.vmem [resolvable:$false] %s553_s7 }
  0x29   : > { %s555_s18 = scalar_lea.vmem %s554_s7, 256  ;;  %p556_p9 = scmp.lt.s32.totalorder %s815_s8, %s554_s7 }
  0x2a   : > { %p551_p6 = pnand %p549_p3, %p535_p5  ;;  %p557_p4 = scmp.lt.s32.totalorder %s555_s18, %s548_s4 }
  0x2c   : > { %p552_p11 = pneg %p551_p6  ;;  %p558_p10 = por %p557_p4, %p556_p9 }
  0x2e   : > { %p559_p12 = pnand %p558_p10, %p552_p11 }
  0x30   : > { %562 = shalt.err (!%p559_p12)
}
  0x31   : > { %469 = dma.hbm_to_vmem [thread:$0]  (!%p819_p0), %s811_s6, 128, %s815_s8, %s165_s10  }
  0x32   : > { %p997_p1 = scmp.lt.s32.totalorder %s711_s17, 3  ;;  %p998_p2 = scmp.ge.s32.totalorder %s711_s17, 1 }
  0x33   : > { %s864_s22 = scalar_lea.hbm %s987_s1, %s444_s30  ;;  %s187_s23 = scalar_lea.vmem [#allocation5], %s443_s29 }
  0x34   : > { %p855_p7 = pnand %p998_p2, %p997_p1  ;;  %s195_s4 = sshll.u32 %s187_s23, 4  ;;  %s196_s4 = int_to_ptr.vmem [resolvable:$true] %s195_s4 }
  0x35   : > { %s184_s6 = scalar_lea.sflag [#allocation6], %s802_s28  ;;  %s563_s8 = scalar_lea.hbm %s864_s22, 128 }
  0x36   : > { %s999_s11 = scalar_select %p855_p7, 1, 0 }
  0x37   : > { %p564_p9 = scmp.ne.s32.totalorder %s864_s22, %s563_s8  ;;  %s568_s30 = scalar_lea.hbm %s987_s1, 256 }
  0x38   : > { %p569_p3 = scmp.lt.u32.totalorder %s864_s22, %s987_s1  ;;  %p570_p6 = scmp.lt.u32.totalorder %s568_s30, %s563_s8 }
  0x39   : > { %p566_p11 = pnand %p564_p9, %p535_p5  ;;  %p572_p10 = scmp.lt.u32.totalorder %s563_s8, %s864_s22 }
  0x3a   : > { %p571_p4 = por %p570_p6, %p569_p3 }
  0x3b   : > { %p567_p13 = pneg %p566_p11 }
  0x3c   : > { %p573_p12 = por %p572_p10, %p571_p4 }
  0x3e   : > { %p574_p1 = pnand %p573_p12, %p567_p13 }
  0x40   : > { %577 = shalt.err (!%p574_p1)
}
  0x41   : > { %s578_s28 = scalar_lea.vmem %s196_s4, 128  ;;  %s714_s29 = smov [#allocation5]  }
  0x42   : > { %p579_p2 = scmp.ne.s32.totalorder %s196_s4, %s578_s28  ;;  %s583_s19 = sshll.u32 %s714_s29, 4  ;;  %s584_s19 = int_to_ptr.vmem [resolvable:$false] %s583_s19 }
  0x43   : > { %s585_s21 = scalar_lea.vmem %s584_s19, 256  ;;  %p586_p8 = scmp.lt.s32.totalorder %s196_s4, %s584_s19 }
  0x44   : > { %p581_p9 = pnand %p579_p2, %p535_p5  ;;  %p587_p7 = scmp.lt.s32.totalorder %s585_s21, %s578_s28 }
  0x46   : > { %p582_p11 = pneg %p581_p9  ;;  %p588_p3 = por %p587_p7, %p586_p8 }
  0x48   : > { %p589_p6 = pnand %p588_p3, %p582_p11 }
  0x4a   : > { %592 = shalt.err (!%p589_p6)
}
  0x4b   : > { %472 = dma.hbm_to_vmem [thread:$0]  (!%p819_p0), %s864_s22, 128, %s196_s4, %s184_s6  }
  0x4c   : > { %p1000_p13 = scmp.ne.s32.totalorder %s999_s11, 0 }
  0x4d   : > { %s891_s23 = sand.u32 (!%p1000_p13), 1, %s695_s13   ;;  %p1001_p5 = scmp.ne.s32.totalorder (!%p1000_p13), %s993_s24, 0 }
  0x4e   : > { %204 = sbr.rel (%p1000_p13) target bundleno = 145 (0x91), region = 28  ;;  %s448_s8 = sshll.u32 (!%p1000_p13), %s891_s23, 3 }
  0x4f   : > { %s207_s10 = scalar_lea.sflag (!%p1000_p13), [#allocation3], %s891_s23  ;;  %s210_s5 = scalar_lea.vmem (!%p1000_p13), [#allocation2], %s448_s8 }
  0x55   : > { %674 = dma.done.wait (%p1001_p5), %s207_s10, 128  }
  0x56   : > { %676 = vsyncadd (%p1001_p5), %s207_s10, 4294967168  ;;  %s216_s9 = scalar_lea.sflag [#allocation6], %s891_s23  ;;  %s219_s22 = scalar_lea.vmem [#allocation5], %s448_s8 }
  0x57   : > { %678 = dma.done.wait (%p1001_p5), %s216_s9, 128  }
  0x58   : > { %680 = vsyncadd (%p1001_p5), %s216_s9, 4294967168  ;;  %v258_v0 = vld [vmem:[%s210_s5] sm:$0xff]  ;;  %v259_v4 = vld [vmem:[%s219_s22] sm:$0xff]  ;;  %s454_s11 = sshll.u32 %s703_s15, 7  ;;  %s244_s4 = scalar_lea.vmem [#allocation7], %s448_s8 }
  0x59   : > { %v260_v1 = vmul.f32 0.5, %v258_v0  ;;  %s291_s6 = sshll.u32 %s244_s4, 4  ;;  %s251_s30 = scalar_lea.vmem [#allocation8], %s448_s8  ;;  %s910_s6 = int_to_ptr.vmem [resolvable:$true] %s291_s6 }
  0x5a   : > { %s304_s7 = sshll.u32 %s251_s30, 4  ;;  %s908_s24 = scalar_lea.hbm %s988_s2, %s454_s11  ;;  %s917_s7 = int_to_ptr.vmem [resolvable:$true] %s304_s7 }
  0x5b   : > { %531 = vtanh.f32 %v260_v1  ;;  %s915_s15 = scalar_lea.hbm %s989_s3, %s454_s11  ;;  %s273_s21 = scalar_lea.sflag [#allocation4], %s891_s23 }
  0x5c   : > { %s593_s8 = scalar_lea.vmem %s910_s6, 128  ;;  %p1002_p0 = scmp.ne.s32.totalorder %s994_s25, 0 }
  0x5d   : > { %p594_p8 = scmp.ne.s32.totalorder %s910_s6, %s593_s8  ;;  %s715_s10 = smov [#allocation7]  }
  0x5e   : > { %s597_s5 = sshll.u32 %s715_s10, 4  ;;  %s598_s5 = int_to_ptr.vmem [resolvable:$false] %s597_s5 }
  0x5f   : > { %p595_p7 = pnand %p594_p8, %p1002_p0  ;;  %s599_s9 = scalar_lea.vmem %s598_s5, 256 }
  0x60   : > { %p600_p10 = scmp.lt.s32.totalorder %s910_s6, %s598_s5  ;;  %p601_p12 = scmp.lt.s32.totalorder %s599_s9, %s593_s8 }
  0x61   : > { %p596_p4 = pneg %p595_p7 }
  0x62   : > { %p602_p1 = por %p601_p12, %p600_p10 }
  0x64   : > { %p603_p2 = pnand %p602_p1, %p596_p4 }
  0x65   : > { %v532_v2 = vpop.eup %531 }
  0x66   : > { %v262_v3 = vmul.f32 0.5, %v532_v2 }
  0x68   : > { %v263_v5 = vadd.f32 0.5, %v262_v3 }
  0x6a   : > { %v266_v6 = vmul.f32 %v263_v5, %v259_v4  ;;  %v269_v7 = vadd.f32 %v263_v5, %v259_v4 }
  0x6c   : > { %270 = vst [vmem:[%s244_s4] sm:$0xff] %v266_v6  ;;  %271 = vst [vmem:[%s251_s30] sm:$0xff] %v269_v7 }
  0x6d   : > { %606 = shalt.err (!%p603_p2)
}
  0x6e   : > { %s607_s22 = scalar_lea.hbm %s908_s24, 128  ;;  %s611_s30 = scalar_lea.hbm %s988_s2, 256 }
  0x6f   : > { %p608_p9 = scmp.ne.s32.totalorder %s908_s24, %s607_s22  ;;  %p612_p6 = scmp.lt.u32.totalorder %s908_s24, %s988_s2 }
  0x70   : > { %p613_p13 = scmp.lt.u32.totalorder %s611_s30, %s607_s22  ;;  %p615_p8 = scmp.lt.u32.totalorder %s607_s22, %s908_s24 }
  0x71   : > { %p609_p11 = pnand %p608_p9, %p1002_p0 }
  0x72   : > { %p614_p5 = por %p613_p13, %p612_p6 }
  0x73   : > { %p610_p3 = pneg %p609_p11 }
  0x74   : > { %p616_p7 = por %p615_p8, %p614_p5 }
  0x76   : > { %p617_p4 = pnand %p616_p7, %p610_p3 }
  0x78   : > { %620 = shalt.err (!%p617_p4)
}
  0x79   : > { %462 = dma.vmem_to_hbm [thread:$0]  (%p1002_p0), %s910_s6, 128, %s908_s24, %s273_s21  }
  0x7a   : > { %s278_s29 = scalar_lea.sflag [#allocation9], %s891_s23  ;;  %s621_s19 = scalar_lea.vmem %s917_s7, 128 }
  0x7b   : > { %p622_p10 = scmp.ne.s32.totalorder %s917_s7, %s621_s19  ;;  %s716_s8 = smov [#allocation8]  }
  0x7c   : > { %s625_s10 = sshll.u32 %s716_s8, 4  ;;  %s626_s10 = int_to_ptr.vmem [resolvable:$false] %s625_s10 }
  0x7d   : > { %p623_p12 = pnand %p622_p10, %p1002_p0  ;;  %s627_s5 = scalar_lea.vmem %s626_s10, 256 }
  0x7e   : > { %p628_p2 = scmp.lt.s32.totalorder %s917_s7, %s626_s10  ;;  %p629_p9 = scmp.lt.s32.totalorder %s627_s5, %s621_s19 }
  0x7f   : > { %p624_p1 = pneg %p623_p12 }
  0x80   : > { %p630_p11 = por %p629_p9, %p628_p2 }
  0x82   : > { %p631_p3 = pnand %p630_p11, %p624_p1 }
  0x84   : > { %634 = shalt.err (!%p631_p3)
}
  0x85   : > { %s635_s23 = scalar_lea.hbm %s915_s15, 128  ;;  %s639_s21 = scalar_lea.hbm %s989_s3, 256 }
  0x86   : > { %p636_p6 = scmp.ne.s32.totalorder %s915_s15, %s635_s23  ;;  %p640_p8 = scmp.lt.u32.totalorder %s915_s15, %s989_s3 }
  0x87   : > { %p641_p7 = scmp.lt.u32.totalorder %s639_s21, %s635_s23  ;;  %p643_p10 = scmp.lt.u32.totalorder %s635_s23, %s915_s15 }
  0x88   : > { %p637_p13 = pnand %p636_p6, %p1002_p0 }
  0x89   : > { %p642_p4 = por %p641_p7, %p640_p8 }
  0x8a   : > { %p638_p5 = pneg %p637_p13 }
  0x8b   : > { %p644_p12 = por %p643_p10, %p642_p4 }
  0x8d   : > { %p645_p1 = pnand %p644_p12, %p638_p5 }
  0x8f   : > { %648 = shalt.err (!%p645_p1)
}
  0x90   : > { %463 = dma.vmem_to_hbm [thread:$0]  (%p1002_p0), %s917_s7, 128, %s915_s15, %s278_s29  }
  0x91 PF: > { %s316_s11 = sand.u32 1, %s691_s12   ;;  %p1003_p2 = scmp.ne.s32.totalorder %s995_s27, 0 }
  0x92   : > { %p1004_p9 = scmp.ge.s32.totalorder %s711_s17, 2  ;;  %s317_s4 = scalar_lea.sflag [#allocation4], %s316_s11 }
  0x94   : > { %p474_p11 = pnand %p1004_p9, %p1003_p2 }
  0x96   : > { %682 = dma.done.wait (!%p474_p11), %s317_s4, 128  }
  0x97   : > { %684 = vsyncadd (!%p474_p11), %s317_s4, 4294967168  ;;  %s326_s30 = scalar_lea.sflag [#allocation9], %s316_s11 }
  0x98   : > { %686 = dma.done.wait (!%p474_p11), %s326_s30, 128  }
  0x99   : > { %688 = vsyncadd (!%p474_p11), %s326_s30, 4294967168  ;;  %s26_s17 = sadd.s32 1, %s711_s17   ;;  %s1005_s12 = smov %s695_s13 }
  0x9a   : > { %p23_p3 = scmp.ge.s32.totalorder %s26_s17, 4   ;;  %s1006_s13 = smov %s699_s14 }
  0x9b   : > { %s1007_s14 = smov %s793_s26  ;;  %s1008_s15 = smov %s707_s16 }
  0x9c   : > { %s1009_s16 = smov %s1011_s20  ;;  %25 = sbr.rel (!%p23_p3) target bundleno = 10 (0xa), region = 107 }
  0xa3   :  { %331 = vsyncpa [#allocation3], 1 }
  0xa4   :  { %333 = vsyncpa [#allocation3 + $0x1], 1 }
  0xa5   :  { %334 = vsyncpa [#allocation6], 1 }
  0xa6   :  { %336 = vsyncpa [#allocation6 + $0x1], 1 }
  0xa7   :  { %337 = vsyncpa [#allocation4], 1 }
  0xa8   :  { %339 = vsyncpa [#allocation4 + $0x1], 1 }
  0xa9   :  { %340 = vsyncpa [#allocation9], 1 }
  0xaa   :  { %342 = vsyncpa [#allocation9 + $0x1], 1 }

</bundles_post_ra>
